<compile_context>
chip_gen: v7x
topology: tpu7x:2x2x1
jax: 0.10.0
libtpu: 0.0.40
codegen_flags: <defaults>
</compile_context>

<pallas_src>
import jax
import jax.numpy as jnp
from jax.experimental import pallas as pl
from jax.experimental.pallas import tpu as pltpu

INPUT_DIM = 768
HIDDEN_DIM = 256
OUTPUT_DIM = 2
OUT_PAD = 128  # lane-dense padded output width (last dim multiple of 128)


def _round_up(x, m):
    return ((x + m - 1) // m) * m


def mlp_kernel(x_ref, w1_ref, b1_ref, w2_ref, b2_ref, o_ref):
    # x arrives f32 from HBM; cast to bf16 in-register for the MXU (avoids a
    # separate wrapper-side convert pass over the activation tensor).
    x = x_ref[...].astype(jnp.bfloat16)
    # Linear 1 on MXU: bf16 operands, f32 accumulation.
    h = jnp.dot(x, w1_ref[...], preferred_element_type=jnp.float32)
    h = h + b1_ref[...]            # (tm, HIDDEN) + (1, HIDDEN) broadcast, f32 on VPU
    h = jnp.maximum(h, 0.0)        # ReLU in f32 (VPU fast path, incl. v5e)
    # Dropout(p=0.2): identity in eval/inference mode.
    # Linear 2 on MXU: cast hidden back to bf16 only for the matmul LHS.
    out = jnp.dot(h.astype(jnp.bfloat16), w2_ref[...],
                  preferred_element_type=jnp.float32)
    out = out + b2_ref[...]        # (tm, OUT_PAD) + (1, OUT_PAD) broadcast
    o_ref[...] = out.astype(o_ref.dtype)   # bf16 lane-dense store


def _pick_tm(B, target_tm):
    """Batch tile: large (up to target_tm) for streaming efficiency, 8-aligned,
    and capped so the parallel batch axis has >= 2 grid steps when the batch
    allows it (v7x has 2 TensorCores per chip)."""
    tm = min(target_tm, _round_up(B, 8))
    if B > 8:
        tm = min(tm, max(8, _round_up((B + 1) // 2, 8)))
    return max(8, tm)


def bert_mlp_forward(x, w1, b1, w2, b2, *, tm=1024):
    """x: (B, 768) f32; w1: (768,256); b1: (256,); w2: (256,2); b2: (2,) -> (B, 2)."""
    B, D = x.shape
    assert D == INPUT_DIM

    tm = _pick_tm(B, tm)
    grid = (pl.cdiv(B, tm),)

    # Small one-time weight prep (resident in VMEM across all grid steps).
    w1_b = w1.astype(jnp.bfloat16)
    w2_b = jnp.pad(w2.astype(jnp.bfloat16),
                   ((0, 0), (0, OUT_PAD - OUTPUT_DIM)))
    b1_2d = b1.reshape(1, HIDDEN_DIM).astype(jnp.float32)
    b2_2d = jnp.pad(b2.reshape(1, OUTPUT_DIM).astype(jnp.float32),
                    ((0, 0), (0, OUT_PAD - OUTPUT_DIM)))

    flops = 2 * B * (INPUT_DIM * HIDDEN_DIM + HIDDEN_DIM * OUT_PAD)
    bytes_accessed = (x.size * 4                       # f32 activations streamed in
                      + w1_b.size * 2 + w2_b.size * 2  # resident bf16 weights
                      + b1_2d.size * 4 + b2_2d.size * 4
                      + B * OUT_PAD * 2)               # bf16 padded output slab

    out_padded = pl.pallas_call(
        mlp_kernel,
        out_shape=jax.ShapeDtypeStruct((B, OUT_PAD), jnp.bfloat16),
        grid_spec=pltpu.PrefetchScalarGridSpec(
            num_scalar_prefetch=0,
            grid=grid,
            in_specs=[
                pl.BlockSpec((tm, INPUT_DIM), lambda i: (i, 0)),          # x tile (streamed, f32)
                pl.BlockSpec((INPUT_DIM, HIDDEN_DIM), lambda i: (0, 0)),  # W1 (resident)
                pl.BlockSpec((1, HIDDEN_DIM), lambda i: (0, 0)),          # b1 (resident)
                pl.BlockSpec((HIDDEN_DIM, OUT_PAD), lambda i: (0, 0)),    # W2 padded (resident)
                pl.BlockSpec((1, OUT_PAD), lambda i: (0, 0)),             # b2 padded (resident)
            ],
            out_specs=pl.BlockSpec((tm, OUT_PAD), lambda i: (i, 0)),
        ),
        compiler_params=pltpu.CompilerParams(
            dimension_semantics=("parallel",),
        ),
        cost_estimate=pl.CostEstimate(
            flops=flops, transcendentals=0, bytes_accessed=bytes_accessed),
    )(x, w1_b, b1_2d, w2_b, b2_2d)

    # Drop the lane padding of the output; return in the caller's dtype.
    return out_padded[:, :OUTPUT_DIM].astype(x.dtype)


def reference_forward(x, w1, b1, w2, b2):
    h = jnp.maximum(x @ w1 + b1, 0.0)
    return h @ w2 + b2


if __name__ == "__main__":
    key = jax.random.PRNGKey(0)
    k_x, k_w1, k_b1, k_w2, k_b2 = jax.random.split(key, 5)

    B = 10  # small batch, intentionally NOT a multiple of 8 to exercise partial blocks
    x = jax.random.normal(k_x, (B, INPUT_DIM), dtype=jnp.float32)

    # Deterministic parameter init (mimics uniform scaling of nn.Linear)
    lim1 = 1.0 / (INPUT_DIM ** 0.5)
    lim2 = 1.0 / (HIDDEN_DIM ** 0.5)
    w1 = jax.random.uniform(k_w1, (INPUT_DIM, HIDDEN_DIM), jnp.float32, -lim1, lim1)
    b1 = jax.random.uniform(k_b1, (HIDDEN_DIM,), jnp.float32, -lim1, lim1)
    w2 = jax.random.uniform(k_w2, (HIDDEN_DIM, OUTPUT_DIM), jnp.float32, -lim2, lim2)
    b2 = jax.random.uniform(k_b2, (OUTPUT_DIM,), jnp.float32, -lim2, lim2)

    out = bert_mlp_forward(x, w1, b1, w2, b2)
    out = jax.block_until_ready(out)

    ref = reference_forward(x, w1, b1, w2, b2)
    assert out.shape == (B, OUTPUT_DIM)
    # Loosened tolerance: bf16 MXU operands + bf16 output store, f32 accumulation.
    assert jnp.allclose(out, ref, atol=3e-2, rtol=3e-2), (
        f"max abs err {jnp.max(jnp.abs(out - ref))}")

    print("KERNEL_OK")
</pallas_src>

<mosaic_0001>
module attributes {stable_mosaic.version = 11 : i64} {
  func.func @mlp_kernel(%arg0: i32, %arg1: memref<8x768xf32, #tpu.memory_space<vmem>>, %arg2: memref<768x256xbf16, #tpu.memory_space<vmem>>, %arg3: memref<1x256xf32, #tpu.memory_space<vmem>>, %arg4: memref<256x128xbf16, #tpu.memory_space<vmem>>, %arg5: memref<1x128xf32, #tpu.memory_space<vmem>>, %arg6: memref<8x128xbf16, #tpu.memory_space<vmem>>) attributes {dimension_semantics = [#tpu.dimension_semantics<parallel>], iteration_bounds = array<i64: 2>, scalar_prefetch = 0 : i64, scratch_operands = 0 : i64, tpu.core_type = #tpu.core_type<tc>, window_params = [{transform_indices = @transform_0, window_bounds = array<i64: 8, 768>}, {pipeline_mode = #tpu.pipeline_mode<synchronous>, transform_indices = @transform_1, window_bounds = array<i64: 768, 256>}, {pipeline_mode = #tpu.pipeline_mode<synchronous>, transform_indices = @transform_2, window_bounds = array<i64: 1, 256>}, {pipeline_mode = #tpu.pipeline_mode<synchronous>, transform_indices = @transform_3, window_bounds = array<i64: 256, 128>}, {pipeline_mode = #tpu.pipeline_mode<synchronous>, transform_indices = @transform_4, window_bounds = array<i64: 1, 128>}, {transform_indices = @transform_5, window_bounds = array<i64: 8, 128>}]} {
    %c0 = arith.constant 0 : index
    %c0_0 = arith.constant 0 : index
    %0 = vector.load %arg1[%c0, %c0_0] : memref<8x768xf32, #tpu.memory_space<vmem>>, vector<8x768xf32>
    %1 = arith.truncf %0 : vector<8x768xf32> to vector<8x768xbf16>
    %c0_1 = arith.constant 0 : index
    %c0_2 = arith.constant 0 : index
    %2 = vector.load %arg2[%c0_1, %c0_2] : memref<768x256xbf16, #tpu.memory_space<vmem>>, vector<768x256xbf16>
    %cst = arith.constant dense<0.000000e+00> : vector<8x256xf32>
    %3 = tpu.matmul %1, %2, %cst {dimension_numbers = #tpu.dot_dimension_numbers<[1], [0], [0], [1], [0, 0, 1, 1], [], []>} : vector<8x768xbf16>, vector<768x256xbf16>, vector<8x256xf32> -> vector<8x256xf32>
    %c0_3 = arith.constant 0 : index
    %c0_4 = arith.constant 0 : index
    %4 = vector.load %arg3[%c0_3, %c0_4] : memref<1x256xf32, #tpu.memory_space<vmem>>, vector<1x256xf32>
    %5 = vector.broadcast %4 : vector<1x256xf32> to vector<8x256xf32>
    %6 = arith.addf %3, %5 : vector<8x256xf32>
    %cst_5 = arith.constant 0.000000e+00 : f32
    %7 = vector.broadcast %cst_5 : f32 to vector<8x256xf32>
    %8 = arith.maximumf %6, %7 : vector<8x256xf32>
    %9 = arith.truncf %8 : vector<8x256xf32> to vector<8x256xbf16>
    %c0_6 = arith.constant 0 : index
    %c0_7 = arith.constant 0 : index
    %10 = vector.load %arg4[%c0_6, %c0_7] : memref<256x128xbf16, #tpu.memory_space<vmem>>, vector<256x128xbf16>
    %cst_8 = arith.constant dense<0.000000e+00> : vector<8x128xf32>
    %11 = tpu.matmul %9, %10, %cst_8 {dimension_numbers = #tpu.dot_dimension_numbers<[1], [0], [0], [1], [0, 0, 1, 1], [], []>} : vector<8x256xbf16>, vector<256x128xbf16>, vector<8x128xf32> -> vector<8x128xf32>
    %c0_9 = arith.constant 0 : index
    %c0_10 = arith.constant 0 : index
    %12 = vector.load %arg5[%c0_9, %c0_10] : memref<1x128xf32, #tpu.memory_space<vmem>>, vector<1x128xf32>
    %13 = vector.broadcast %12 : vector<1x128xf32> to vector<8x128xf32>
    %14 = arith.addf %11, %13 : vector<8x128xf32>
    %15 = arith.truncf %14 : vector<8x128xf32> to vector<8x128xbf16>
    %c0_11 = arith.constant 0 : index
    %c0_12 = arith.constant 0 : index
    %16 = vector.load %arg6[%c0_11, %c0_12] : memref<8x128xbf16, #tpu.memory_space<vmem>>, vector<8x128xbf16>
    tpu.vector_store %arg6[%c0_11, %c0_12], %15 {strides = array<i32>} : memref<8x128xbf16, #tpu.memory_space<vmem>>, vector<8x128xbf16>,
    return
  }
  func.func @transform_0(%arg0: i32) -> (i32, i32) {
    %c0_i32 = arith.constant 0 : i32
    %c0_i32_0 = arith.constant 0 : i32
    return %arg0, %c0_i32 : i32, i32
  }
  func.func @transform_1(%arg0: i32) -> (i32, i32) {
    %c0_i32 = arith.constant 0 : i32
    %c0_i32_0 = arith.constant 0 : i32
    %c0_i32_1 = arith.constant 0 : i32
    return %c0_i32, %c0_i32_0 : i32, i32
  }
  func.func @transform_2(%arg0: i32) -> (i32, i32) {
    %c0_i32 = arith.constant 0 : i32
    %c0_i32_0 = arith.constant 0 : i32
    %c0_i32_1 = arith.constant 0 : i32
    return %c0_i32, %c0_i32_0 : i32, i32
  }
  func.func @transform_3(%arg0: i32) -> (i32, i32) {
    %c0_i32 = arith.constant 0 : i32
    %c0_i32_0 = arith.constant 0 : i32
    %c0_i32_1 = arith.constant 0 : i32
    return %c0_i32, %c0_i32_0 : i32, i32
  }
  func.func @transform_4(%arg0: i32) -> (i32, i32) {
    %c0_i32 = arith.constant 0 : i32
    %c0_i32_0 = arith.constant 0 : i32
    %c0_i32_1 = arith.constant 0 : i32
    return %c0_i32, %c0_i32_0 : i32, i32
  }
  func.func @transform_5(%arg0: i32) -> (i32, i32) {
    %c0_i32 = arith.constant 0 : i32
    %c0_i32_0 = arith.constant 0 : i32
    return %arg0, %c0_i32 : i32, i32
  }
}

</mosaic_0001>

<bundles_post_ra>
// kernel: tpu_custom_call.1
= control target key start
LH: loop header
LB: loop body
LE: loop exit
PB: predicated region body
PF: predicated region fallthrough
CT: control target
= control target key end

     0   :  { %10 = vsyncpa [#allocation3], 0  ;;  %s2109_s0 = inlined_call_operand.hbm [shape: f32[10,768], index: 0, kind: input, shape index: {}]   ;;  %s2110_s1 = inlined_call_operand.hbm [shape: bf16[768,256], index: 1, kind: input, shape index: {}]   ;;  %s2111_s2 = inlined_call_operand.vmem [shape: f32[1,256], index: 2, kind: input, shape index: {}]   ;;  %s2112_s3 = inlined_call_operand.hbm [shape: bf16[256,128], index: 3, kind: input, shape index: {}]   ;;  %s2113_s4 = inlined_call_operand.vmem [shape: f32[1,128], index: 4, kind: input, shape index: {}]   ;;  %s2114_s5 = inlined_call_operand.hbm [shape: bf16[10,128], index: 5, kind: output, shape index: {}]  }
   0x1   :  { %12 = vsyncpa [#allocation3 + $0x1], 0 }
   0x2   :  { %13 = vsyncpa [#allocation6], 0 }
   0x3   :  { %14 = vsyncpa [#allocation4], 0 }
   0x4   :  { %16 = vsyncpa [#allocation4 + $0x1], 0  ;;  %s1865_s18 = smov 0   ;;  %s1867_s19 = smov 0  }
   0x5   :  { %s1869_s20 = smov 0   ;;  %s1871_s21 = smov 0  }
   0x6 LB: > { %s1886_s22 = sadd.s32 4294967295, %s1825_s21   ;;  %s1278_s23 = sadd.s32 4294967294, %s1825_s21   ;;  %s1825_s21 = sphi %s1871_s21, %s2134_s21   ;;  %s1821_s20 = sphi %s1869_s20, %s2133_s20   ;;  %s1817_s19 = sphi %s1867_s19, %s2132_s19   ;;  %s1813_s18 = sphi %s1865_s18, %s2131_s18  }
   0x7   : > { %p42_p0 = scmp.ne.s32.totalorder %s1817_s19, %s1813_s18  ;;  %p2115_p1 = scmp.eq.s32.totalorder %s1886_s22, 0 }
   0x8   : > { %p156_p3 = scmp.eq.s32.totalorder %s1278_s23, 1  ;;  %p1279_p5 = scmp.ge.s32.totalorder %s1825_s21, 1 }
   0x9   : > { %p1895_p4 = por %p2115_p1, %p42_p0  ;;  %p163_p7 = scmp.lt.s32.totalorder %s1825_s21, 3 }
   0xa   : > { %p1900_p6 = por %p156_p3, %p42_p0  ;;  %s1827_s27 = smov [#allocation5]  }
   0xb   : > { %s2118_s24 = scalar_select %p1895_p4, 1, 0 }
   0xc   : > { %s2119_s25 = scalar_select %p1900_p6, 1, 0 }
   0xd   : > { %p1905_p8 = pnand %p1279_p5, %p163_p7  ;;  %s175_s28 = sshll.u32 %s1827_s27, 4  ;;  %s1909_s28 = int_to_ptr.vmem [resolvable:$true] %s175_s28 }
   0xe   : > { %s1828_s30 = smov [#allocation7]   ;;  %s1669_s9 = scalar_lea.hbm %s2110_s1, 12288 }
   0xf   : > { %p1450_p9 = pneg %p1905_p8  ;;  %s191_s6 = sshll.u32 %s1828_s30, 4  ;;  %s1920_s6 = int_to_ptr.vmem [resolvable:$true] %s191_s6 }
  0x10   : > { %p1670_p12 = scmp.ne.s32.totalorder %s2110_s1, %s1669_s9  ;;  %p1676_p5 = scmp.lt.u32.totalorder %s1669_s9, %s2110_s1 }
  0x11   : > { %p1916_p11 = pnand %p1450_p9, %p2115_p1 }
  0x13   : > { %p1671_p13 = pneg %p1916_p11 }
  0x15   : > { %p1672_p0 = pnand %p1671_p13, %p1670_p12 }
  0x17   : > { %p1673_p3 = pneg %p1672_p0 }
  0x19   : > { %p1678_p7 = pnand %p1676_p5, %p1673_p3 }
  0x1b   : > { %1681 = shalt.err (!%p1678_p7)
}
  0x1c   : > { %s1682_s14 = scalar_lea.vmem %s1909_s28, 12288  ;;  %p1690_p2 = scmp.lt.s32.totalorder %s1909_s28, %s1909_s28 }
  0x1d   : > { %p1683_p9 = scmp.ne.s32.totalorder %s1909_s28, %s1682_s14  ;;  %p1691_p12 = scmp.lt.s32.totalorder %s1682_s14, %s1682_s14 }
  0x1f   : > { %p1685_p10 = pnand %p1683_p9, %p1671_p13  ;;  %p1692_p0 = por %p1691_p12, %p1690_p2 }
  0x21   : > { %p1686_p1 = pneg %p1685_p10 }
  0x23   : > { %p1693_p6 = pnand %p1692_p0, %p1686_p1 }
  0x25   : > { %1696 = shalt.err (!%p1693_p6)
}
  0x26   : > { %s1829_s15 = smov 128   ;;  %s1830_s16 = smov 8  }
  0x27   : > { %1453 = dma.hbm_to_vmem [thread:$0]  (!%p1916_p11), %s2110_s1, 12288, %s1909_s28, [#allocation6], %s1829_s15, %s1829_s15, %s1830_s16  }
  0x28   : > { %s1697_s7 = scalar_lea.hbm %s2112_s3, 2048 }
  0x29   : > { %p1698_p2 = scmp.ne.s32.totalorder %s2112_s3, %s1697_s7  ;;  %p1704_p10 = scmp.lt.u32.totalorder %s1697_s7, %s2112_s3 }
  0x2b   : > { %p1700_p1 = pnand %p1698_p2, %p1671_p13 }
  0x2d   : > { %p1701_p6 = pneg %p1700_p1 }
  0x2f   : > { %p1706_p3 = pnand %p1704_p10, %p1701_p6 }
  0x31   : > { %1709 = shalt.err (!%p1706_p3)
}
  0x32   : > { %s1710_s28 = scalar_lea.vmem %s1920_s6, 2048  ;;  %p1718_p12 = scmp.lt.s32.totalorder %s1920_s6, %s1920_s6 }
  0x33   : > { %p1711_p5 = scmp.ne.s32.totalorder %s1920_s6, %s1710_s28  ;;  %p1719_p0 = scmp.lt.s32.totalorder %s1710_s28, %s1710_s28 }
  0x35   : > { %p1713_p7 = pnand %p1711_p5, %p1671_p13  ;;  %p1720_p2 = por %p1719_p0, %p1718_p12 }
  0x37   : > { %p1714_p9 = pneg %p1713_p7 }
  0x39   : > { %p1721_p1 = pnand %p1720_p2, %p1714_p9 }
  0x3b   : > { %1724 = shalt.err (!%p1721_p1)
}
  0x3c   : > { %s1831_s12 = smov 64   ;;  %s1832_s13 = smov 4  }
  0x3d   : > { %1456 = dma.hbm_to_vmem [thread:$0]  (!%p1916_p11), %s2112_s3, 2048, %s1920_s6, [#allocation6], %s1831_s12, %s1831_s12, %s1832_s13  }
  0x3e   : > { %s1975_s16 = sadd.s32 1, %s1825_s21   ;;  %s29_s23 = sadd.s32 1, %s1821_s20 }
  0x3f   : > { %s26_s17 = ssub.s32 %s1825_s21, %s1975_s16  ;;  %p36_p6 = scmp.ne.s32.totalorder %s1821_s20, %s1817_s19 }
  0x40   : > { %p27_p13 = scmp.eq.s32.totalorder %s26_s17, 0  ;;  %p37_p10 = scmp.eq.s32.totalorder %s1825_s21, 0 }
  0x41   : > { %p2122_p5 = scmp.eq.s32.totalorder %s1886_s22, 1  ;;  %p1467_p9 = scmp.lt.s32.totalorder %s1825_s21, 2 }
  0x42   : > { %s1984_s27 = scalar_select %p27_p13, %s1821_s20, %s29_s23  }
  0x43   : > { %p38_p3 = por %p37_p10, %p36_p6  ;;  %p1988_p7 = por %p2122_p5, %p36_p6 }
  0x44   : > { %s208_s29 = sand.u32 1, %s1821_s20   ;;  %s1436_s6 = smul.u32 768, %s1825_s21 }
  0x45   : > { %s2123_s30 = scalar_select %p1988_p7, 1, 0 }
  0x46   : > { %s1435_s7 = smul.u32 48, %s208_s29  ;;  %p1995_p11 = pnand %p1467_p9, %p38_p3 }
  0x47   : > { %s2002_s11 = scalar_lea.hbm %s2109_s0, %s1436_s6  ;;  %s209_s13 = scalar_lea.sflag [#allocation3], %s208_s29 }
  0x48   : > { %s212_s28 = scalar_lea.vmem [#allocation2], %s1435_s7  ;;  %s1725_s14 = scalar_lea.hbm %s2002_s11, 768 }
  0x49   : > { %s220_s12 = sshll.u32 %s212_s28, 4  ;;  %p1726_p12 = scmp.ne.s32.totalorder %s2002_s11, %s1725_s14  ;;  %s2004_s12 = int_to_ptr.vmem [resolvable:$true] %s220_s12 }
  0x4a   : > { %p1727_p0 = pneg %p1995_p11  ;;  %s1730_s23 = scalar_lea.hbm %s2109_s0, 1536 }
  0x4b   : > { %p1731_p13 = scmp.lt.u32.totalorder %s2002_s11, %s2109_s0  ;;  %p1732_p6 = scmp.lt.u32.totalorder %s1730_s23, %s1725_s14 }
  0x4c   : > { %p1728_p2 = pnand %p1727_p0, %p1726_p12  ;;  %p1734_p3 = scmp.lt.u32.totalorder %s1725_s14, %s2002_s11 }
  0x4d   : > { %p1733_p10 = por %p1732_p6, %p1731_p13 }
  0x4e   : > { %p1729_p1 = pneg %p1728_p2 }
  0x4f   : > { %p1735_p5 = por %p1734_p3, %p1733_p10 }
  0x51   : > { %p1736_p9 = pnand %p1735_p5, %p1729_p1 }
  0x53   : > { %1739 = shalt.err (!%p1736_p9)
}
  0x54   : > { %s1740_s29 = scalar_lea.vmem %s2004_s12, 768  ;;  %s1833_s7 = smov [#allocation2]  }
  0x55   : > { %p1741_p12 = scmp.ne.s32.totalorder %s2004_s12, %s1740_s29  ;;  %s1745_s10 = sshll.u32 %s1833_s7, 4  ;;  %s1746_s10 = int_to_ptr.vmem [resolvable:$false] %s1745_s10 }
  0x56   : > { %s1747_s28 = scalar_lea.vmem %s1746_s10, 1536  ;;  %p1748_p4 = scmp.lt.s32.totalorder %s2004_s12, %s1746_s10 }
  0x57   : > { %p1743_p2 = pnand %p1741_p12, %p1727_p0  ;;  %p1749_p13 = scmp.lt.s32.totalorder %s1747_s28, %s1740_s29 }
  0x59   : > { %p1744_p7 = pneg %p1743_p2  ;;  %p1750_p6 = por %p1749_p13, %p1748_p4 }
  0x5b   : > { %p1751_p10 = pnand %p1750_p6, %p1744_p7 }
  0x5d   : > { %1754 = shalt.err (!%p1751_p10)
}
  0x5e   : > { %1460 = dma.hbm_to_vmem [thread:$0]  (!%p1995_p11), %s2002_s11, 768, %s2004_s12, %s209_s13  }
  0x5f   : > { %229 = sbr.rel (%p1905_p8) target bundleno = 688 (0x2b0), region = 40  ;;  %s2034_s14 = sand.u32 (!%p1905_p8), 1, %s1817_s19  }
  0x60   : > { %s1437_s15 = smul.u32 (!%p1905_p8), 48, %s2034_s14  ;;  %s232_s17 = scalar_lea.sflag (!%p1905_p8), [#allocation3], %s2034_s14 }
  0x61   : > { %p2125_p4 = scmp.ne.s32.totalorder (!%p1905_p8), %s2118_s24, 0 }
  0x62   : > { %s2038_s23 = scalar_lea.vmem (!%p1905_p8), [#allocation2], %s1437_s15 }
  0x66   : > { %1800 = dma.done.wait (%p2125_p4), %s232_s17, 768  }
  0x67   : > { %1802 = vsyncadd (%p2125_p4), %s232_s17, 4294966528  ;;  %p2126_p7 = scmp.eq.s32.totalorder %s1886_s22, 0 }
  0x69   : > { %1804 = dma.done.wait (%p2126_p7), [#allocation6], 14336   ;;  %p2127_p8 = pmov %p2126_p7 }
  0x6a   : > { %v1509_v0 = vld [vmem:[#allocation5 + $0x104] ss:$8 sps:$4 sm:$0xff]   ;;  %v1511_v1 = vld [vmem:[#allocation5 + $0x100] ss:$8 sps:$4 sm:$0xff]   ;;  %v1512_v2 = vld [vmem:[#allocation5 + $0x114] ss:$8 sps:$4 sm:$0xff]  }
  0x6b   : > { %1806 = vsyncadd (%p2127_p8), [#allocation6], 4294952960  ;;  %912 = vmatprep.subr.bf16.mxu0 %v1509_v0  ;;  %v1514_v3 = vld [vmem:[#allocation5 + $0x110] ss:$8 sps:$4 sm:$0xff]   ;;  %v1515_v4 = vld [vmem:[#allocation5 + $0x124] ss:$8 sps:$4 sm:$0xff]  }
  0x6c   : > { %913 = vmatpush1.bf16.msra.mxu0 %v1511_v1  ;;  %v1517_v5 = vld [vmem:[#allocation5 + $0x120] ss:$8 sps:$4 sm:$0xff]   ;;  %v1518_v6 = vld [vmem:[#allocation5 + $0x134] ss:$8 sps:$4 sm:$0xff]   ;;  %v1520_v7 = vld [vmem:[#allocation5 + $0x130] ss:$8 sps:$4 sm:$0xff]  }
  0x6d   : > { %914 = vmatprep.subr.bf16.mxu0 %v1512_v2  ;;  %v1521_v8 = vld [vmem:[#allocation5 + $0x144] ss:$8 sps:$4 sm:$0xff]   ;;  %v1523_v9 = vld [vmem:[#allocation5 + $0x140] ss:$8 sps:$4 sm:$0xff]   ;;  %v1524_v10 = vld [vmem:[#allocation5 + $0x154] ss:$8 sps:$4 sm:$0xff]  }
  0x6e   : > { %v1526_v11 = vld [vmem:[#allocation5 + $0x150] ss:$8 sps:$4 sm:$0xff]   ;;  %v1527_v12 = vld [vmem:[#allocation5 + $0x164] ss:$8 sps:$4 sm:$0xff]   ;;  %v1556_v14 = vld [vmem:[#allocation5] ss:$8 sps:$4 sm:$0xff]  }
  0x6f   : > { %v1554_v13 = vld [vmem:[#allocation5 + $0x4] ss:$8 sps:$4 sm:$0xff]   ;;  %v1529_v15 = vld [vmem:[#allocation5 + $0x160] ss:$8 sps:$4 sm:$0xff]   ;;  %v1530_v16 = vld [vmem:[#allocation5 + $0x174] ss:$8 sps:$4 sm:$0xff]  }
  0x70   : > { %915 = vmatpush1.bf16.msra.mxu0 %v1514_v3  ;;  %871 = vmatprep.subr.bf16.mxu1 %v1554_v13  ;;  %v1560_v17 = vld [vmem:[#allocation5 + $0x14] ss:$8 sps:$4 sm:$0xff]   ;;  %v1562_v18 = vld [vmem:[#allocation5 + $0x10] ss:$8 sps:$4 sm:$0xff]   ;;  %v1566_v22 = vld [vmem:[#allocation5 + $0x24] ss:$8 sps:$4 sm:$0xff]  }
  0x71   : > { %916 = vmatprep.subr.bf16.mxu0 %v1515_v4  ;;  %872 = vmatpush1.bf16.msra.mxu1 %v1556_v14  ;;  %v274_v19 = vld [vmem:[%s2038_s23 + $0x18] sm:$0xff]  ;;  %v273_v55 = vld [vmem:[%s2038_s23 + $0x10] sm:$0xff]  ;;  %v272_v63 = vld [vmem:[%s2038_s23 + $0x8] sm:$0xff]  ;;  %s1287_s8 = sshll.u32 %s2034_s14, 2  ;;  %s1402_s13 = sshll.u32 %s1886_s22, 6 }
  0x72   : > { %v1532_v20 = vld [vmem:[#allocation5 + $0x170] ss:$8 sps:$4 sm:$0xff]   ;;  %873 = vmatprep.subr.bf16.mxu1 %v1560_v17  ;;  %v280_v21 = vpack.c.bf16 %v274_v19, %v274_v19  ;;  %v1568_v23 = vld [vmem:[#allocation5 + $0x20] ss:$8 sps:$4 sm:$0xff]   ;;  %v1533_v24 = vld [vmem:[#allocation5 + $0x184] ss:$8 sps:$4 sm:$0xff]   ;;  %v279_v60 = vpack.c.bf16 %v273_v55, %v273_v55  ;;  %v278_v1 = vpack.c.bf16 %v272_v63, %v272_v63  ;;  %s2065_s10 = scalar_lea.hbm %s2114_s5, %s1402_s13 }
  0x73   : > { %v1572_v25 = vld [vmem:[#allocation5 + $0x34] ss:$8 sps:$4 sm:$0xff]   ;;  %v1535_v26 = vld [vmem:[#allocation5 + $0x180] ss:$8 sps:$4 sm:$0xff]   ;;  %v1574_v27 = vld [vmem:[#allocation5 + $0x30] ss:$8 sps:$4 sm:$0xff]  }
  0x74   : > { %917 = vmatpush1.bf16.msra.mxu0 %v1517_v5  ;;  %944 = vmatprep.mubr.bf16.mxu0 %v280_v21  ;;  %v1536_v28 = vld [vmem:[#allocation5 + $0x194] ss:$8 sps:$4 sm:$0xff]   ;;  %v1578_v29 = vld [vmem:[#allocation5 + $0x44] ss:$8 sps:$4 sm:$0xff]   ;;  %v1538_v30 = vld [vmem:[#allocation5 + $0x190] ss:$8 sps:$4 sm:$0xff]  }
  0x75   : > { %918 = vmatprep.subr.bf16.mxu0 %v1518_v6  ;;  %874 = vmatpush1.bf16.msra.mxu1 %v1562_v18  ;;  %v1580_v31 = vld [vmem:[#allocation5 + $0x40] ss:$8 sps:$4 sm:$0xff]   ;;  %v1539_v32 = vld [vmem:[#allocation5 + $0x1a4] ss:$8 sps:$4 sm:$0xff]   ;;  %v1584_v33 = vld [vmem:[#allocation5 + $0x54] ss:$8 sps:$4 sm:$0xff]  }
  0x76   : > { %875 = vmatprep.subr.bf16.mxu1 %v1566_v22  ;;  %v1541_v34 = vld [vmem:[#allocation5 + $0x1a0] ss:$8 sps:$4 sm:$0xff]   ;;  %v1586_v35 = vld [vmem:[#allocation5 + $0x50] ss:$8 sps:$4 sm:$0xff]   ;;  %v1542_v36 = vld [vmem:[#allocation5 + $0x1b4] ss:$8 sps:$4 sm:$0xff]   ;;  %903 = vmatprep.mubr.bf16.mxu1 %v278_v1 }
  0x77   : > { %v1590_v37 = vld [vmem:[#allocation5 + $0x64] ss:$8 sps:$4 sm:$0xff]   ;;  %v1544_v38 = vld [vmem:[#allocation5 + $0x1b0] ss:$8 sps:$4 sm:$0xff]   ;;  %v1592_v39 = vld [vmem:[#allocation5 + $0x60] ss:$8 sps:$4 sm:$0xff]  }
  0x78   : > { %919 = vmatpush1.bf16.msra.mxu0 %v1520_v7  ;;  %v1545_v40 = vld [vmem:[#allocation5 + $0x1c4] ss:$8 sps:$4 sm:$0xff]   ;;  %v1596_v41 = vld [vmem:[#allocation5 + $0x74] ss:$8 sps:$4 sm:$0xff]   ;;  %v1547_v42 = vld [vmem:[#allocation5 + $0x1c0] ss:$8 sps:$4 sm:$0xff]  }
  0x79   : > { %920 = vmatprep.subr.bf16.mxu0 %v1521_v8  ;;  %876 = vmatpush1.bf16.msra.mxu1 %v1568_v23  ;;  %v1598_v43 = vld [vmem:[#allocation5 + $0x70] ss:$8 sps:$4 sm:$0xff]   ;;  %v1548_v44 = vld [vmem:[#allocation5 + $0x1d4] ss:$8 sps:$4 sm:$0xff]   ;;  %v1602_v45 = vld [vmem:[#allocation5 + $0x84] ss:$8 sps:$4 sm:$0xff]  }
  0x7a   : > { %877 = vmatprep.subr.bf16.mxu1 %v1572_v25  ;;  %v1550_v46 = vld [vmem:[#allocation5 + $0x1d0] ss:$8 sps:$4 sm:$0xff]   ;;  %v1604_v47 = vld [vmem:[#allocation5 + $0x80] ss:$8 sps:$4 sm:$0xff]   ;;  %v1551_v48 = vld [vmem:[#allocation5 + $0x1e4] ss:$8 sps:$4 sm:$0xff]  }
  0x7b   : > { %v1608_v49 = vld [vmem:[#allocation5 + $0x94] ss:$8 sps:$4 sm:$0xff]   ;;  %v1553_v50 = vld [vmem:[#allocation5 + $0x1e0] ss:$8 sps:$4 sm:$0xff]   ;;  %v1610_v51 = vld [vmem:[#allocation5 + $0x90] ss:$8 sps:$4 sm:$0xff]  }
  0x7c   : > { %921 = vmatpush1.bf16.msra.mxu0 %v1523_v9  ;;  %v1557_v52 = vld [vmem:[#allocation5 + $0x1f4] ss:$8 sps:$4 sm:$0xff]   ;;  %v1614_v53 = vld [vmem:[#allocation5 + $0xa4] ss:$8 sps:$4 sm:$0xff]   ;;  %v1559_v54 = vld [vmem:[#allocation5 + $0x1f0] ss:$8 sps:$4 sm:$0xff]  }
  0x7d   : > { %922 = vmatprep.subr.bf16.mxu0 %v1524_v10  ;;  %878 = vmatpush1.bf16.msra.mxu1 %v1574_v27  ;;  %v1616_v56 = vld [vmem:[#allocation5 + $0xa0] ss:$8 sps:$4 sm:$0xff]   ;;  %v1565_v57 = vld [vmem:[#allocation5 + $0x204] ss:$8 sps:$4 sm:$0xff]   ;;  %v1620_v58 = vld [vmem:[#allocation5 + $0xb4] ss:$8 sps:$4 sm:$0xff]  }
  0x7e   : > { %879 = vmatprep.subr.bf16.mxu1 %v1578_v29  ;;  %v1563_v59 = vld [vmem:[#allocation5 + $0x200] ss:$8 sps:$4 sm:$0xff]   ;;  %v1571_v61 = vld [vmem:[#allocation5 + $0x214] ss:$8 sps:$4 sm:$0xff]   ;;  %v1622_v62 = vld [vmem:[#allocation5 + $0xb0] ss:$8 sps:$4 sm:$0xff]  }
  0x7f   : > { %v1626_v0 = vld [vmem:[#allocation5 + $0xc4] ss:$8 sps:$4 sm:$0xff]   ;;  %v1569_v2 = vld [vmem:[#allocation5 + $0x210] ss:$8 sps:$4 sm:$0xff]   ;;  %v1628_v6 = vld [vmem:[#allocation5 + $0xc0] ss:$8 sps:$4 sm:$0xff]  }
  0x80   : > { %923 = vmatpush1.bf16.msra.mxu0 %v1526_v11  ;;  %v276_v3 = vld [vmem:[%s2038_s23 + $0x28] sm:$0xff]  ;;  %v271_v18 = vld [vmem:[%s2038_s23] sm:$0xff]  ;;  %s269_s6 = scalar_lea.vmem [#allocation8], %s1287_s8  ;;  %s1176_s28 = scalar_lea.sflag [#allocation4], %s2034_s14 }
  0x81   : > { %924 = vmatprep.subr.bf16.mxu0 %v1527_v12  ;;  %880 = vmatpush1.bf16.msra.mxu1 %v1580_v31  ;;  %v1577_v4 = vld [vmem:[#allocation5 + $0x224] ss:$8 sps:$4 sm:$0xff]   ;;  %v282_v5 = vpack.c.bf16 %v276_v3, %v276_v3  ;;  %v1632_v7 = vld [vmem:[#allocation5 + $0xd4] ss:$8 sps:$4 sm:$0xff]   ;;  %v1575_v8 = vld [vmem:[#allocation5 + $0x220] ss:$8 sps:$4 sm:$0xff]   ;;  %v277_v21 = vpack.c.bf16 %v271_v18, %v271_v18 }
  0x82   : > { %881 = vmatprep.subr.bf16.mxu1 %v1584_v33  ;;  %v1583_v9 = vld [vmem:[#allocation5 + $0x234] ss:$8 sps:$4 sm:$0xff]   ;;  %v1634_v10 = vld [vmem:[#allocation5 + $0xd0] ss:$8 sps:$4 sm:$0xff]   ;;  %v1638_v11 = vld [vmem:[#allocation5 + $0xe4] ss:$8 sps:$4 sm:$0xff]  }
  0x83   : > { %v1581_v12 = vld [vmem:[#allocation5 + $0x230] ss:$8 sps:$4 sm:$0xff]   ;;  %v1589_v13 = vld [vmem:[#allocation5 + $0x244] ss:$8 sps:$4 sm:$0xff]   ;;  %v1640_v14 = vld [vmem:[#allocation5 + $0xe0] ss:$8 sps:$4 sm:$0xff]  }
  0x84   : > { %925 = vmatpush1.bf16.msra.mxu0 %v1529_v15  ;;  %v1644_v15 = vld [vmem:[#allocation5 + $0xf4] ss:$8 sps:$4 sm:$0xff]   ;;  %v1646_v17 = vld [vmem:[#allocation5 + $0xf0] ss:$8 sps:$4 sm:$0xff]   ;;  %v1654_v23 = vld [vmem:[#allocation7] sm:$0xff]   ;;  %s1189_s9 = sshll.u32 %s269_s6, 4  ;;  %s2067_s9 = int_to_ptr.vmem [resolvable:$true] %s1189_s9 }
  0x85   : > { %926 = vmatprep.subr.bf16.mxu0 %v1530_v16  ;;  %882 = vmatpush1.bf16.msra.mxu1 %v1586_v35  ;;  %v1587_v16 = vld [vmem:[#allocation5 + $0x240] ss:$8 sps:$4 sm:$0xff]   ;;  %v1595_v19 = vld [vmem:[#allocation5 + $0x254] ss:$8 sps:$4 sm:$0xff]   ;;  %v1593_v22 = vld [vmem:[#allocation5 + $0x250] ss:$8 sps:$4 sm:$0xff]  }
  0x86   : > { %883 = vmatprep.subr.bf16.mxu1 %v1590_v37  ;;  %v1655_v25 = vld [vmem:[#allocation7 + $0x48] sm:$0xff]   ;;  %v1657_v29 = vld [vmem:[#allocation7 + $0x50] sm:$0xff]   ;;  %v1659_v33 = vld [vmem:[#allocation7 + $0x58] sm:$0xff]   ;;  %s1755_s15 = scalar_lea.vmem %s2067_s9, 64  ;;  %p2128_p0 = scmp.ne.s32.totalorder %s2123_s30, 0 }
  0x87   : > { %v1656_v27 = vld [vmem:[#allocation7 + $0x8] sm:$0xff]   ;;  %v1658_v31 = vld [vmem:[#allocation7 + $0x10] sm:$0xff]   ;;  %v1660_v35 = vld [vmem:[#allocation7 + $0x18] sm:$0xff]   ;;  %p1756_p11 = scmp.ne.s32.totalorder %s2067_s9, %s1755_s15  ;;  %s1834_s22 = smov [#allocation8]  }
  0x88   : > { %927 = vmatpush1.bf16.msra.mxu0 %v1532_v20  ;;  %v1653_v20 = vld [vmem:[#allocation7 + $0x40] sm:$0xff]   ;;  %v1664_v55 = vld [vmem:[#allocation7 + $0x28] sm:$0xff]   ;;  %s1759_s17 = sshll.u32 %s1834_s22, 4  ;;  %s1760_s17 = int_to_ptr.vmem [resolvable:$false] %s1759_s17 }
  0x89   : > { %928 = vmatprep.subr.bf16.mxu0 %v1533_v24  ;;  %884 = vmatpush1.bf16.msra.mxu1 %v1592_v39  ;;  %v1601_v24 = vld [vmem:[#allocation5 + $0x264] ss:$8 sps:$4 sm:$0xff]   ;;  %v379_v3 = vld [vmem:[%s2111_s2] sm:$0x3]  ;;  %p1757_p1 = pnand %p1756_p11, %p2128_p0  ;;  %p1762_p5 = scmp.lt.s32.totalorder %s2067_s9, %s1760_s17 }
  0x8a   : > { %885 = vmatprep.subr.bf16.mxu1 %v1596_v41  ;;  %v1661_v37 = vld [vmem:[#allocation7 + $0x60] sm:$0xff]  }
  0x8b   : > { %v1662_v39 = vld [vmem:[#allocation7 + $0x20] sm:$0xff]   ;;  %p1758_p3 = pneg %p1757_p1 }
  0x8c   : > { %929 = vmatpush1.bf16.msra.mxu0 %v1535_v26  ;;  %v1599_v26 = vld [vmem:[#allocation5 + $0x260] ss:$8 sps:$4 sm:$0xff]  }
  0x8d   : > { %930 = vmatprep.subr.bf16.mxu0 %v1536_v28  ;;  %886 = vmatpush1.bf16.msra.mxu1 %v1598_v43  ;;  %v1607_v28 = vld [vmem:[#allocation5 + $0x274] ss:$8 sps:$4 sm:$0xff]   ;;  %v1623_v41 = vld [vmem:[#allocation5 + $0x2a0] ss:$8 sps:$4 sm:$0xff]   ;;  %v1629_v43 = vld [vmem:[#allocation5 + $0x2b0] ss:$8 sps:$4 sm:$0xff]  }
  0x8e   : > { %887 = vmatprep.subr.bf16.mxu1 %v1602_v45  ;;  %v1635_v45 = vld [vmem:[#allocation5 + $0x2c0] ss:$8 sps:$4 sm:$0xff]  }
  0x90   : > { %931 = vmatpush1.bf16.msra.mxu0 %v1538_v30  ;;  %v1605_v30 = vld [vmem:[#allocation5 + $0x270] ss:$8 sps:$4 sm:$0xff]  }
  0x91   : > { %932 = vmatprep.subr.bf16.mxu0 %v1539_v32  ;;  %888 = vmatpush1.bf16.msra.mxu1 %v1604_v47  ;;  %v1613_v32 = vld [vmem:[#allocation5 + $0x284] ss:$8 sps:$4 sm:$0xff]   ;;  %v1641_v47 = vld [vmem:[#allocation5 + $0x2d0] ss:$8 sps:$4 sm:$0xff]  }
  0x92   : > { %889 = vmatprep.subr.bf16.mxu1 %v1608_v49  ;;  %v1647_v49 = vld [vmem:[#allocation5 + $0x2e0] ss:$8 sps:$4 sm:$0xff]  }
  0x94   : > { %933 = vmatpush1.bf16.msra.mxu0 %v1541_v34  ;;  %v1611_v34 = vld [vmem:[#allocation5 + $0x280] ss:$8 sps:$4 sm:$0xff]  }
  0x95   : > { %934 = vmatprep.subr.bf16.mxu0 %v1542_v36  ;;  %890 = vmatpush1.bf16.msra.mxu1 %v1610_v51  ;;  %v1619_v36 = vld [vmem:[#allocation5 + $0x294] ss:$8 sps:$4 sm:$0xff]   ;;  %v1650_v51 = vld [vmem:[#allocation5 + $0x2f0] ss:$8 sps:$4 sm:$0xff]  }
  0x96   : > { %891 = vmatprep.subr.bf16.mxu1 %v1614_v53 }
  0x98   : > { %935 = vmatpush1.bf16.msra.mxu0 %v1544_v38  ;;  %v1617_v38 = vld [vmem:[#allocation5 + $0x290] ss:$8 sps:$4 sm:$0xff]  }
  0x99   : > { %936 = vmatprep.subr.bf16.mxu0 %v1545_v40  ;;  %892 = vmatpush1.bf16.msra.mxu1 %v1616_v56  ;;  %v1625_v40 = vld [vmem:[#allocation5 + $0x2a4] ss:$8 sps:$4 sm:$0xff]   ;;  %v1665_v56 = vld [vmem:[#allocation7 + $0x70] sm:$0xff]  }
  0x9a   : > { %893 = vmatprep.subr.bf16.mxu1 %v1620_v58  ;;  %v1667_v58 = vld [vmem:[#allocation7 + $0x78] sm:$0xff]  }
  0x9c   : > { %937 = vmatpush1.bf16.msra.mxu0 %v1547_v42  ;;  %v1631_v42 = vld [vmem:[#allocation5 + $0x2b4] ss:$8 sps:$4 sm:$0xff]  }
  0x9d   : > { %938 = vmatprep.subr.bf16.mxu0 %v1548_v44  ;;  %894 = vmatpush1.bf16.msra.mxu1 %v1622_v62  ;;  %v1637_v44 = vld [vmem:[#allocation5 + $0x2c4] ss:$8 sps:$4 sm:$0xff]  }
  0x9e   : > { %895 = vmatprep.subr.bf16.mxu1 %v1626_v0  ;;  %v381_v0 = vlaneseq }
  0xa0   : > { %939 = vmatpush1.bf16.msra.mxu0 %v1550_v46  ;;  %v1643_v46 = vld [vmem:[#allocation5 + $0x2d4] ss:$8 sps:$4 sm:$0xff]   ;;  %v382_v1 = vshrl.u32 %v381_v0, 7 }
  0xa1   : > { %940 = vmatprep.subr.bf16.mxu0 %v1551_v48  ;;  %896 = vmatpush1.bf16.msra.mxu1 %v1628_v6  ;;  %v1649_v48 = vld [vmem:[#allocation5 + $0x2e4] ss:$8 sps:$4 sm:$0xff]  }
  0xa2   : > { %897 = vmatprep.subr.bf16.mxu1 %v1632_v7 }
  0xa4   : > { %941 = vmatpush1.bf16.msra.mxu0 %v1553_v50  ;;  %v1652_v50 = vld [vmem:[#allocation5 + $0x2f4] ss:$8 sps:$4 sm:$0xff]  }
  0xa5   : > { %942 = vmatprep.subr.bf16.mxu0 %v1557_v52  ;;  %898 = vmatpush1.bf16.msra.mxu1 %v1634_v10  ;;  %v275_v52 = vld [vmem:[%s2038_s23 + $0x20] sm:$0xff]  ;;  %s1761_s23 = scalar_lea.vmem %s1760_s17, 128 }
  0xa6   : > { %899 = vmatprep.subr.bf16.mxu1 %v1638_v11  ;;  %v281_v53 = vpack.c.bf16 %v275_v52, %v275_v52  ;;  %p1763_p9 = scmp.lt.s32.totalorder %s1761_s23, %s1755_s15 }
  0xa8   : > { %943 = vmatpush1.bf16.msra.mxu0 %v1559_v54  ;;  %v1663_v54 = vld [vmem:[#allocation7 + $0x68] sm:$0xff]   ;;  %p1764_p12 = por %p1763_p9, %p1762_p5 }
  0xa9   : > { %953 = vmatprep.subr.bf16.mxu0 %v1565_v57  ;;  %900 = vmatpush1.bf16.msra.mxu1 %v1640_v14  ;;  %v1666_v57 = vld [vmem:[#allocation7 + $0x30] sm:$0xff]  }
  0xaa   : > { %901 = vmatprep.subr.bf16.mxu1 %v1644_v15  ;;  %p1765_p2 = pnand %p1764_p12, %p1758_p3 }
  0xab   : > { %945 = vmatmul.mubr.bf16.vlgmr.msra.gmra.mrb[0].mxu0 %v279_v60 }
  0xac   : > { %954 = vmatpush1.bf16.msra.mxu0 %v1563_v59  ;;  %985 = vmatprep.mubr.bf16.mxu0 %v282_v5  ;;  %v1668_v59 = vld [vmem:[#allocation7 + $0x38] sm:$0xff]  }
  0xad   : > { %955 = vmatprep.subr.bf16.mxu0 %v1571_v61  ;;  %902 = vmatpush1.bf16.msra.mxu1 %v1646_v17 }
  0xae   : > { %1405 = vmatprep.subr.bf16.mxu1 %v1653_v20  ;;  %v1384_v20 = vld [vmem:[%s2113_s4] ss:$0 sm:$0xff] }
  0xb0   : > { %956 = vmatpush1.bf16.msra.mxu0 %v1569_v2  ;;  %904 = vmatmul.mubr.bf16.vlgmr.msra.gmra.mrb[0].mxu1 %v277_v21  ;;  %v383_v2 = vsub.s32 0, %v382_v1 }
  0xb1   : > { %957 = vmatprep.subr.bf16.mxu0 %v1577_v4  ;;  %1406 = vmatpush3.bf16.msra.mxu1 %v1654_v23  ;;  %v387_v4 = vsub.s32 1, %v382_v1 }
  0xb2   : > { %1407 = vmatprep.subr.bf16.mxu1 %v1655_v25  ;;  %v384_v5 = vrot.slane %v379_v3, %v383_v2 }
  0xb3   : > { %v388_v6 = vrot.slane %v379_v3, %v387_v4 }
  0xb4   : > { %958 = vmatpush1.bf16.msra.mxu0 %v1575_v8 }
  0xb5   : > { %959 = vmatprep.subr.bf16.mxu0 %v1583_v9  ;;  %1408 = vmatpush3.bf16.msra.mxu1 %v1656_v27 }
  0xb6   : > { %1409 = vmatprep.subr.bf16.mxu1 %v1657_v29 }
  0xb8   : > { %960 = vmatpush1.bf16.msra.mxu0 %v1581_v12 }
  0xb9   : > { %961 = vmatprep.subr.bf16.mxu0 %v1589_v13  ;;  %1410 = vmatpush3.bf16.msra.mxu1 %v1658_v31 }
  0xba   : > { %1411 = vmatprep.subr.bf16.mxu1 %v1659_v33 }
  0xbc   : > { %962 = vmatpush1.bf16.msra.mxu0 %v1587_v16 }
  0xbd   : > { %963 = vmatprep.subr.bf16.mxu0 %v1595_v19  ;;  %1412 = vmatpush3.bf16.msra.mxu1 %v1660_v35 }
  0xbe   : > { %1413 = vmatprep.subr.bf16.mxu1 %v1661_v37 }
  0xc0   : > { %964 = vmatpush1.bf16.msra.mxu0 %v1593_v22 }
  0xc1   : > { %965 = vmatprep.subr.bf16.mxu0 %v1601_v24  ;;  %1414 = vmatpush3.bf16.msra.mxu1 %v1662_v39 }
  0xc2   : > { %1415 = vmatprep.subr.bf16.mxu1 %v1663_v54 }
  0xc4   : > { %966 = vmatpush1.bf16.msra.mxu0 %v1599_v26 }
  0xc5   : > { %967 = vmatprep.subr.bf16.mxu0 %v1607_v28  ;;  %1416 = vmatpush3.bf16.msra.mxu1 %v1664_v55 }
  0xc6   : > { %1417 = vmatprep.subr.bf16.mxu1 %v1665_v56 }
  0xc8   : > { %968 = vmatpush1.bf16.msra.mxu0 %v1605_v30 }
  0xc9   : > { %969 = vmatprep.subr.bf16.mxu0 %v1613_v32  ;;  %1418 = vmatpush3.bf16.msra.mxu1 %v1666_v57 }
  0xca   : > { %1419 = vmatprep.subr.bf16.mxu1 %v1667_v58 }
  0xcc   : > { %970 = vmatpush1.bf16.msra.mxu0 %v1611_v34 }
  0xcd   : > { %971 = vmatprep.subr.bf16.mxu0 %v1619_v36  ;;  %1420 = vmatpush3.bf16.msra.mxu1 %v1668_v59 }
  0xd0   : > { %972 = vmatpush1.bf16.msra.mxu0 %v1617_v38 }
  0xd1   : > { %973 = vmatprep.subr.bf16.mxu0 %v1625_v40 }
  0xd4   : > { %974 = vmatpush1.bf16.msra.mxu0 %v1623_v41 }
  0xd5   : > { %975 = vmatprep.subr.bf16.mxu0 %v1631_v42 }
  0xd8   : > { %976 = vmatpush1.bf16.msra.mxu0 %v1629_v43 }
  0xd9   : > { %977 = vmatprep.subr.bf16.mxu0 %v1637_v44 }
  0xdc   : > { %978 = vmatpush1.bf16.msra.mxu0 %v1635_v45 }
  0xdd   : > { %979 = vmatprep.subr.bf16.mxu0 %v1643_v46 }
  0xe0   : > { %980 = vmatpush1.bf16.msra.mxu0 %v1641_v47 }
  0xe1   : > { %981 = vmatprep.subr.bf16.mxu0 %v1649_v48 }
  0xe4   : > { %982 = vmatpush1.bf16.msra.mxu0 %v1647_v49 }
  0xe5   : > { %983 = vmatprep.subr.bf16.mxu0 %v1652_v50 }
  0xe8   : > { %984 = vmatpush1.bf16.msra.mxu0 %v1650_v51 }
  0xeb   : > { %986 = vmatmul.mubr.bf16.vlgmr.msra.gmra.mrb[0].mxu0 %v281_v53 }
 0x183   : > { %v905_v60 = vpop.f32.mrb[0].mxu1 }
 0x184   : > { %v907_v61 = vpop.f32.mrb[1].mxu1  ;;  %v906_v7 = vadd.f32 %v905_v60, %v384_v5 }
 0x185   : > { %v909_v62 = vpop.f32.mrb[2].mxu1  ;;  %v908_v8 = vadd.f32 %v907_v61, %v388_v6 }
 0x186   : > { %v910_v63 = vpop.f32.mrb[3].mxu1 }
 0x1be   : > { %v987_v9 = vpop.f32.mrb[0].mxu0 }
 0x1bf   : > { %v1428_v10 = vadd.f32 %v987_v9, %v906_v7  ;;  %v989_v11 = vpop.f32.mrb[1].mxu0 }
 0x1c0   : > { %v1430_v12 = vadd.f32 %v989_v11, %v908_v8  ;;  %v991_v13 = vpop.f32.mrb[2].mxu0 }
 0x1c1   : > { %v994_v14 = vmax.f32 %v1428_v10, 0.0  ;;  %v992_v15 = vpop.f32.mrb[3].mxu0 }
 0x1c2   : > { %v995_v16 = vmax.f32 %v1430_v12, 0.0 }
 0x1c3   : > { %v996_v18 = vpack.c.bf16 %v994_v14, %v994_v14 }
 0x1c4   : > { %v997_v17 = vpack.c.bf16 %v995_v16, %v995_v16 }
 0x1c6   : > { %1165 = vmatprep.mubr.bf16.mxu1 %v997_v17 }
 0x1c7   : > { %1166 = vmatmul.mubr.bf16.vlgmr.msra.gmra.mrb[4].mxu1 %v996_v18 }
 0x29a   : > { %v1421_v19 = vpop.f32.mrb[4].mxu1 }
 0x29b   : > { %v1422_v21 = vpop.f32.mrb[5].mxu1 }
 0x29c   : > { %v1423_v22 = vadd.f32 %v1422_v21, %v1421_v19  ;;  %v1424_v23 = vpop.f32.mrb[6].mxu1 }
 0x29d   : > { %v1425_v24 = vpop.f32.mrb[7].mxu1 }
 0x29e   : > { %v1168_v25 = vadd.f32 %v1423_v22, %v1384_v20 }
 0x2a0   : > { %v1173_v26 = vpack.c.bf16 %v1168_v25, %v1168_v25 }
 0x2a2   : > { %1174 = vst [vmem:[%s269_s6] sm:$0xf] %v1173_v26 }
 0x2a3   : > { %1768 = shalt.err (!%p1765_p2)
}
 0x2a4   : > { %s1769_s14 = scalar_lea.hbm %s2065_s10, 64  ;;  %s1773_s8 = scalar_lea.hbm %s2114_s5, 128 }
 0x2a5   : > { %p1770_p13 = scmp.ne.s32.totalorder %s2065_s10, %s1769_s14  ;;  %p1774_p4 = scmp.lt.u32.totalorder %s2065_s10, %s2114_s5 }
 0x2a6   : > { %p1775_p7 = scmp.lt.u32.totalorder %s1773_s8, %s1769_s14  ;;  %p1777_p11 = scmp.lt.u32.totalorder %s1769_s14, %s2065_s10 }
 0x2a7   : > { %p1771_p6 = pnand %p1770_p13, %p2128_p0 }
 0x2a8   : > { %p1776_p8 = por %p1775_p7, %p1774_p4 }
 0x2a9   : > { %p1772_p10 = pneg %p1771_p6 }
 0x2aa   : > { %p1778_p1 = por %p1777_p11, %p1776_p8 }
 0x2ac   : > { %p1779_p3 = pnand %p1778_p1, %p1772_p10 }
 0x2ae   : > { %1782 = shalt.err (!%p1779_p3)
}
 0x2af   : > { %1448 = dma.vmem_to_hbm [thread:$0]  (%p2128_p0), %s2067_s9, 64, %s2065_s10, %s1176_s28  }
 0x2b0 PF: > { %s1201_s13 = sand.u32 1, %s1813_s18   ;;  %p2129_p5 = scmp.ne.s32.totalorder %s2119_s25, 0 }
 0x2b1   : > { %p2130_p9 = scmp.ge.s32.totalorder %s1825_s21, 2  ;;  %s1202_s6 = scalar_lea.sflag [#allocation4], %s1201_s13 }
 0x2b3   : > { %p1462_p12 = pnand %p2130_p9, %p2129_p5 }
 0x2b5   : > { %1808 = dma.done.wait (!%p1462_p12), %s1202_s6, 64  }
 0x2b6   : > { %1810 = vsyncadd (!%p1462_p12), %s1202_s6, 4294967232  ;;  %p19_p2 = scmp.ge.s32.totalorder %s1975_s16, 4   ;;  %s2131_s18 = smov %s1817_s19 }
 0x2b7   : > { %s2132_s19 = smov %s1821_s20  ;;  %s2133_s20 = smov %s1984_s27 }
 0x2b8   : > { %s2134_s21 = smov %s1975_s16  ;;  %21 = sbr.rel (!%p19_p2) target bundleno = 6 (0x6), region = 93 }
 0x2bf   :  { %1207 = vsyncpa [#allocation3], 1 }
 0x2c0   :  { %1209 = vsyncpa [#allocation3 + $0x1], 1 }
 0x2c1   :  { %1210 = vsyncpa [#allocation6], 1 }
 0x2c2   :  { %1211 = vsyncpa [#allocation4], 1 }
 0x2c3   :  { %1213 = vsyncpa [#allocation4 + $0x1], 1 }

</bundles_post_ra>
